<compile_context>
chip_gen: v7x
topology: tpu7x:2x2x1
jax: 0.10.0
libtpu: 0.0.40
codegen_flags: <defaults>
</compile_context>

<pallas_src>
import functools

import jax
import jax.numpy as jnp
from jax.experimental import pallas as pl
from jax.experimental.pallas import tpu as pltpu

N_EMBED = 128
DROPOUT_P = 0.1


def ffn_kernel(x_ref, w1_ref, b1_ref, w2_ref, b2_ref, bits_ref, o_ref, *, p):
    # x_ref: (TM, D) bf16    w1_ref: (D, H) bf16   b1_ref: (1, H) f32
    # w2_ref: (H, D) bf16    b2_ref: (1, D) f32
    # bits_ref: (TM, D) u32  o_ref: (TM, D) f32

    # --- Linear 1 + ReLU (MXU bf16 -> f32 accumulate, VPU in f32) ---
    h = jnp.dot(x_ref[...], w1_ref[...], preferred_element_type=jnp.float32)
    h = jnp.maximum(h + b1_ref[...], 0.0)

    # --- Linear 2 (MXU bf16 -> f32 accumulate) ---
    y = jnp.dot(h.astype(w2_ref.dtype), w2_ref[...],
                preferred_element_type=jnp.float32)
    y = y + b2_ref[...]

    # --- Dropout (inverted scaling, train-mode nn.Dropout(p) semantics) ---
    # keep iff bits >= round(p * 2^32)  =>  P(keep) = 1 - p
    threshold = jnp.uint32(int(round(p * (1 << 32))) & 0xFFFFFFFF)
    keep = bits_ref[...] >= threshold
    scale = jnp.float32(1.0 / (1.0 - p))
    o_ref[...] = jnp.where(keep, y * scale, jnp.float32(0.0)).astype(o_ref.dtype)


def feed_forward(x, w1, b1, w2, b2, key, *, p=DROPOUT_P, tm=512):
    """x: (B, T, D) float32. Returns (B, T, D) float32 (train-mode dropout)."""
    B, T, D = x.shape
    H = w1.shape[1]
    M = B * T
    tm = min(tm, M)
    assert M % tm == 0 and tm % 8 == 0 or tm == M
    assert D % 128 == 0 and H % 128 == 0

    # bf16 operands for the MXU (halves DMA bytes too); f32 biases/epilogue.
    x2 = x.reshape(M, D).astype(jnp.bfloat16)
    w1b = w1.astype(jnp.bfloat16)
    w2b = w2.astype(jnp.bfloat16)
    b1_2 = b1.reshape(1, H).astype(jnp.float32)
    b2_2 = b2.reshape(1, D).astype(jnp.float32)

    # Dropout random bits drawn outside the kernel (portable, deterministic).
    bits = jax.random.bits(key, (M, D), dtype=jnp.uint32)

    out = pl.pallas_call(
        functools.partial(ffn_kernel, p=p),
        out_shape=jax.ShapeDtypeStruct((M, D), jnp.float32),
        grid=(M // tm,),
        in_specs=[
            pl.BlockSpec((tm, D), lambda i: (i, 0)),   # x tile
            pl.BlockSpec((D, H), lambda i: (0, 0)),    # w1 (resident)
            pl.BlockSpec((1, H), lambda i: (0, 0)),    # b1
            pl.BlockSpec((H, D), lambda i: (0, 0)),    # w2 (resident)
            pl.BlockSpec((1, D), lambda i: (0, 0)),    # b2
            pl.BlockSpec((tm, D), lambda i: (i, 0)),   # dropout bits tile
        ],
        out_specs=pl.BlockSpec((tm, D), lambda i: (i, 0)),
        compiler_params=pltpu.CompilerParams(
            # Row tiles are independent: shard across v7x's two TensorCores.
            dimension_semantics=("parallel",),
        ),
    )(x2, w1b, b1_2, w2b, b2_2, bits)

    return out.reshape(B, T, D)


def init_params(key, n_embed):
    """Deterministic init mimicking nn.Linear default (uniform +/- 1/sqrt(fan_in))."""
    h = 4 * n_embed
    k1, k2, k3, k4 = jax.random.split(key, 4)
    lim1 = 1.0 / (n_embed ** 0.5)
    lim2 = 1.0 / (h ** 0.5)
    w1 = jax.random.uniform(k1, (n_embed, h), jnp.float32, -lim1, lim1)
    b1 = jax.random.uniform(k2, (h,), jnp.float32, -lim1, lim1)
    w2 = jax.random.uniform(k3, (h, n_embed), jnp.float32, -lim2, lim2)
    b2 = jax.random.uniform(k4, (n_embed,), jnp.float32, -lim2, lim2)
    return w1, b1, w2, b2


if __name__ == "__main__":
    key = jax.random.PRNGKey(0)
    k_x, k_p, k_drop = jax.random.split(key, 3)

    B, T, D = 2, 8, N_EMBED   # small shapes consistent with the module
    x = jax.random.normal(k_x, (B, T, D), dtype=jnp.float32)
    w1, b1, w2, b2 = init_params(k_p, D)

    out = feed_forward(x, w1, b1, w2, b2, k_drop)
    out = jax.block_until_ready(out)

    assert out.shape == (B, T, D)
    assert out.dtype == jnp.float32
    assert bool(jnp.all(jnp.isfinite(out)))
    print("KERNEL_OK")
</pallas_src>

<mosaic_0001>
module attributes {stable_mosaic.version = 11 : i64} {
  func.func @ffn_kernel(%arg0: i32, %arg1: memref<16x128xbf16, #tpu.memory_space<vmem>>, %arg2: memref<128x512xbf16, #tpu.memory_space<vmem>>, %arg3: memref<1x512xf32, #tpu.memory_space<vmem>>, %arg4: memref<512x128xbf16, #tpu.memory_space<vmem>>, %arg5: memref<1x128xf32, #tpu.memory_space<vmem>>, %arg6: memref<16x128xi32, #tpu.memory_space<vmem>>, %arg7: memref<16x128xf32, #tpu.memory_space<vmem>>) attributes {dimension_semantics = [#tpu.dimension_semantics<parallel>], iteration_bounds = array<i64: 1>, scalar_prefetch = 0 : i64, scratch_operands = 0 : i64, tpu.core_type = #tpu.core_type<tc>, window_params = [{transform_indices = @transform_0, window_bounds = array<i64: 16, 128>}, {pipeline_mode = #tpu.pipeline_mode<synchronous>, transform_indices = @transform_1, window_bounds = array<i64: 128, 512>}, {pipeline_mode = #tpu.pipeline_mode<synchronous>, transform_indices = @transform_2, window_bounds = array<i64: 1, 512>}, {pipeline_mode = #tpu.pipeline_mode<synchronous>, transform_indices = @transform_3, window_bounds = array<i64: 512, 128>}, {pipeline_mode = #tpu.pipeline_mode<synchronous>, transform_indices = @transform_4, window_bounds = array<i64: 1, 128>}, {transform_indices = @transform_5, window_bounds = array<i64: 16, 128>}, {transform_indices = @transform_6, window_bounds = array<i64: 16, 128>}]} {
    %c0 = arith.constant 0 : index
    %c0_0 = arith.constant 0 : index
    %0 = vector.load %arg1[%c0, %c0_0] : memref<16x128xbf16, #tpu.memory_space<vmem>>, vector<16x128xbf16>
    %c0_1 = arith.constant 0 : index
    %c0_2 = arith.constant 0 : index
    %1 = vector.load %arg2[%c0_1, %c0_2] : memref<128x512xbf16, #tpu.memory_space<vmem>>, vector<128x512xbf16>
    %cst = arith.constant dense<0.000000e+00> : vector<16x512xf32>
    %2 = tpu.matmul %0, %1, %cst {dimension_numbers = #tpu.dot_dimension_numbers<[1], [0], [0], [1], [0, 0, 1, 1], [], []>} : vector<16x128xbf16>, vector<128x512xbf16>, vector<16x512xf32> -> vector<16x512xf32>
    %c0_3 = arith.constant 0 : index
    %c0_4 = arith.constant 0 : index
    %3 = vector.load %arg3[%c0_3, %c0_4] : memref<1x512xf32, #tpu.memory_space<vmem>>, vector<1x512xf32>
    %4 = vector.broadcast %3 : vector<1x512xf32> to vector<16x512xf32>
    %5 = arith.addf %2, %4 : vector<16x512xf32>
    %cst_5 = arith.constant 0.000000e+00 : f32
    %6 = vector.broadcast %cst_5 : f32 to vector<16x512xf32>
    %7 = arith.maximumf %5, %6 : vector<16x512xf32>
    %8 = arith.truncf %7 : vector<16x512xf32> to vector<16x512xbf16>
    %c0_6 = arith.constant 0 : index
    %c0_7 = arith.constant 0 : index
    %9 = vector.load %arg4[%c0_6, %c0_7] : memref<512x128xbf16, #tpu.memory_space<vmem>>, vector<512x128xbf16>
    %cst_8 = arith.constant dense<0.000000e+00> : vector<16x128xf32>
    %10 = tpu.matmul %8, %9, %cst_8 {dimension_numbers = #tpu.dot_dimension_numbers<[1], [0], [0], [1], [0, 0, 1, 1], [], []>} : vector<16x512xbf16>, vector<512x128xbf16>, vector<16x128xf32> -> vector<16x128xf32>
    %c0_9 = arith.constant 0 : index
    %c0_10 = arith.constant 0 : index
    %11 = vector.load %arg5[%c0_9, %c0_10] : memref<1x128xf32, #tpu.memory_space<vmem>>, vector<1x128xf32>
    %12 = vector.broadcast %11 : vector<1x128xf32> to vector<16x128xf32>
    %13 = arith.addf %10, %12 : vector<16x128xf32>
    %c0_11 = arith.constant 0 : index
    %c0_12 = arith.constant 0 : index
    %14 = vector.load %arg6[%c0_11, %c0_12] : memref<16x128xi32, #tpu.memory_space<vmem>>, vector<16x128xi32>
    %c429496730_i32 = arith.constant 429496730 : i32
    %15 = vector.broadcast %c429496730_i32 : i32 to vector<16x128xi32>
    %16 = arith.cmpi uge, %14, %15 : vector<16x128xi32>
    %cst_13 = arith.constant 1.11111116 : f32
    %17 = vector.broadcast %cst_13 : f32 to vector<16x128xf32>
    %18 = arith.mulf %13, %17 : vector<16x128xf32>
    %cst_14 = arith.constant 0.000000e+00 : f32
    %19 = vector.broadcast %cst_14 : f32 to vector<16x128xf32>
    %20 = arith.select %16, %18, %19 : vector<16x128xi1>, vector<16x128xf32>
    %c0_15 = arith.constant 0 : index
    %c0_16 = arith.constant 0 : index
    %21 = vector.load %arg7[%c0_15, %c0_16] : memref<16x128xf32, #tpu.memory_space<vmem>>, vector<16x128xf32>
    tpu.vector_store %arg7[%c0_15, %c0_16], %20 {strides = array<i32>} : memref<16x128xf32, #tpu.memory_space<vmem>>, vector<16x128xf32>,
    return
  }
  func.func @transform_0(%arg0: i32) -> (i32, i32) {
    %c0_i32 = arith.constant 0 : i32
    %c0_i32_0 = arith.constant 0 : i32
    return %arg0, %c0_i32 : i32, i32
  }
  func.func @transform_1(%arg0: i32) -> (i32, i32) {
    %c0_i32 = arith.constant 0 : i32
    %c0_i32_0 = arith.constant 0 : i32
    %c0_i32_1 = arith.constant 0 : i32
    return %c0_i32, %c0_i32_0 : i32, i32
  }
  func.func @transform_2(%arg0: i32) -> (i32, i32) {
    %c0_i32 = arith.constant 0 : i32
    %c0_i32_0 = arith.constant 0 : i32
    %c0_i32_1 = arith.constant 0 : i32
    return %c0_i32, %c0_i32_0 : i32, i32
  }
  func.func @transform_3(%arg0: i32) -> (i32, i32) {
    %c0_i32 = arith.constant 0 : i32
    %c0_i32_0 = arith.constant 0 : i32
    %c0_i32_1 = arith.constant 0 : i32
    return %c0_i32, %c0_i32_0 : i32, i32
  }
  func.func @transform_4(%arg0: i32) -> (i32, i32) {
    %c0_i32 = arith.constant 0 : i32
    %c0_i32_0 = arith.constant 0 : i32
    %c0_i32_1 = arith.constant 0 : i32
    return %c0_i32, %c0_i32_0 : i32, i32
  }
  func.func @transform_5(%arg0: i32) -> (i32, i32) {
    %c0_i32 = arith.constant 0 : i32
    %c0_i32_0 = arith.constant 0 : i32
    return %arg0, %c0_i32 : i32, i32
  }
  func.func @transform_6(%arg0: i32) -> (i32, i32) {
    %c0_i32 = arith.constant 0 : i32
    %c0_i32_0 = arith.constant 0 : i32
    return %arg0, %c0_i32 : i32, i32
  }
}

</mosaic_0001>

<bundles_post_ra>
// kernel: tpu_custom_call.1
= control target key start
LH: loop header
LB: loop body
LE: loop exit
PB: predicated region body
PF: predicated region fallthrough
CT: control target
= control target key end

     0   :  { %11 = vsyncpa [#allocation3], 0  ;;  %s1222_s0 = inlined_call_operand.hbm [shape: bf16[16,128], index: 0, kind: input, shape index: {}]   ;;  %s1223_s1 = inlined_call_operand.hbm [shape: bf16[128,512], index: 1, kind: input, shape index: {}]   ;;  %s1224_s2 = inlined_call_operand.hbm [shape: f32[1,512], index: 2, kind: input, shape index: {}]   ;;  %s1225_s3 = inlined_call_operand.hbm [shape: bf16[512,128], index: 3, kind: input, shape index: {}]   ;;  %s1226_s4 = inlined_call_operand.vmem [shape: f32[1,128], index: 4, kind: input, shape index: {}]   ;;  %s1227_s5 = inlined_call_operand.vmem [shape: u32[16,128], index: 5, kind: input, shape index: {}]   ;;  %s1228_s6 = inlined_call_operand.hbm [shape: f32[16,128], index: 6, kind: output, shape index: {}]  }
   0x1   :  { %12 = vsyncpa [#allocation6], 0 }
   0x2   :  { %13 = vsyncpa [#allocation9], 0 }
   0x3   :  { %14 = vsyncpa [#allocation4], 0  ;;  %s1093_s21 = smov [#allocation5]   ;;  %s975_s25 = scalar_lea.hbm %s1223_s1, 4096 }
   0x4   :  { %s32_s22 = sshll.u32 %s1093_s21, 4  ;;  %p976_p0 = scmp.ne.s32.totalorder %s1223_s1, %s975_s25  ;;  %s33_s22 = int_to_ptr.vmem [resolvable:$true] %s32_s22 }
   0x5   :  { %p979_p1 = scmp.lt.u32.totalorder %s975_s25, %s1223_s1 }
   0x7   :  { %p981_p2 = pnand %p979_p1, %p976_p0 }
   0x9   :  { %984 = shalt.err (!%p981_p2)
}
   0xa   :  { %s985_s30 = scalar_lea.vmem %s33_s22, 4096  ;;  %p990_p4 = scmp.lt.s32.totalorder %s33_s22, %s33_s22 }
   0xb   :  { %p986_p3 = scmp.ne.s32.totalorder %s33_s22, %s985_s30  ;;  %p991_p5 = scmp.lt.s32.totalorder %s985_s30, %s985_s30 }
   0xd   :  { %p992_p6 = por %p991_p5, %p990_p4 }
   0xf   :  { %p993_p7 = pnand %p992_p6, %p986_p3 }
  0x11   :  { %996 = shalt.err (!%p993_p7)
}
  0x12   :  { %s1094_s7 = smov 256   ;;  %s1095_s8 = smov 16  }
  0x13   :  { %38 = dma.hbm_to_vmem [thread:$0]  %s1223_s1, 4096, %s33_s22, [#allocation6], %s1094_s7, %s1094_s7, %s1095_s8  }
  0x14   :  { %s1096_s11 = smov [#allocation2]   ;;  %s997_s15 = scalar_lea.hbm %s1222_s0, 128 }
  0x15   :  { %s20_s12 = sshll.u32 %s1096_s11, 4  ;;  %p998_p8 = scmp.ne.s32.totalorder %s1222_s0, %s997_s15  ;;  %s21_s12 = int_to_ptr.vmem [resolvable:$true] %s20_s12 }
  0x16   :  { %p1001_p9 = scmp.lt.u32.totalorder %s997_s15, %s1222_s0 }
  0x18   :  { %p1003_p10 = pnand %p1001_p9, %p998_p8 }
  0x1a   :  { %1006 = shalt.err (!%p1003_p10)
}
  0x1b   :  { %s1007_s20 = scalar_lea.vmem %s21_s12, 128  ;;  %p1012_p12 = scmp.lt.s32.totalorder %s21_s12, %s21_s12 }
  0x1c   :  { %p1008_p11 = scmp.ne.s32.totalorder %s21_s12, %s1007_s20  ;;  %p1013_p13 = scmp.lt.s32.totalorder %s1007_s20, %s1007_s20 }
  0x1e   :  { %p1014_p0 = por %p1013_p13, %p1012_p12 }
  0x20   :  { %p1015_p1 = pnand %p1014_p0, %p1008_p11 }
  0x22   :  { %1018 = shalt.err (!%p1015_p1)
}
  0x23   :  { %s1097_s1 = smov 64   ;;  %s1098_s21 = smov 4  }
  0x24   :  { %26 = dma.hbm_to_vmem [thread:$0]  %s1222_s0, 128, %s21_s12, [#allocation3], %s1097_s1, %s1097_s1, %s1098_s21  }
  0x25   :  { %s1099_s24 = smov [#allocation7]   ;;  %s1100_s26 = smov [#allocation8]  }
  0x26   :  { %s45_s25 = sshll.u32 %s1099_s24, 4  ;;  %s54_s27 = sshll.u32 %s1100_s26, 4  ;;  %s46_s25 = int_to_ptr.vmem [resolvable:$true] %s45_s25  ;;  %s1167_s27 = int_to_ptr.vmem [resolvable:$true] %s54_s27 }
  0x27   :  { %s1019_s30 = scalar_lea.hbm %s1224_s2, 64 }
  0x28   :  { %p1020_p2 = scmp.ne.s32.totalorder %s1224_s2, %s1019_s30  ;;  %p1023_p3 = scmp.lt.u32.totalorder %s1019_s30, %s1224_s2 }
  0x2a   :  { %p1025_p4 = pnand %p1023_p3, %p1020_p2 }
  0x2c   :  { %1028 = shalt.err (!%p1025_p4)
}
  0x2d   :  { %s1029_s0 = scalar_lea.vmem %s46_s25, 64  ;;  %p1034_p6 = scmp.lt.s32.totalorder %s46_s25, %s46_s25 }
  0x2e   :  { %p1030_p5 = scmp.ne.s32.totalorder %s46_s25, %s1029_s0  ;;  %p1035_p7 = scmp.lt.s32.totalorder %s1029_s0, %s1029_s0 }
  0x30   :  { %p1036_p8 = por %p1035_p7, %p1034_p6 }
  0x32   :  { %p1037_p9 = pnand %p1036_p8, %p1030_p5 }
  0x34   :  { %1040 = shalt.err (!%p1037_p9)
}
  0x35   :  { %48 = dma.hbm_to_vmem [thread:$0]  %s1224_s2, 64, %s46_s25, [#allocation6]  }
  0x36   :  { %s1041_s15 = scalar_lea.hbm %s1225_s3, 4096 }
  0x37   :  { %p1042_p10 = scmp.ne.s32.totalorder %s1225_s3, %s1041_s15  ;;  %p1045_p11 = scmp.lt.u32.totalorder %s1041_s15, %s1225_s3 }
  0x39   :  { %p1047_p12 = pnand %p1045_p11, %p1042_p10 }
  0x3b   :  { %1050 = shalt.err (!%p1047_p12)
}
  0x3c   :  { %s1051_s20 = scalar_lea.vmem %s1167_s27, 4096  ;;  %p1056_p0 = scmp.lt.s32.totalorder %s1167_s27, %s1167_s27 }
  0x3d   :  { %p1052_p13 = scmp.ne.s32.totalorder %s1167_s27, %s1051_s20  ;;  %p1057_p1 = scmp.lt.s32.totalorder %s1051_s20, %s1051_s20 }
  0x3f   :  { %p1058_p2 = por %p1057_p1, %p1056_p0 }
  0x41   :  { %p1059_p3 = pnand %p1058_p2, %p1052_p13 }
  0x43   :  { %1062 = shalt.err (!%p1059_p3)
}
  0x44   :  { %60 = dma.hbm_to_vmem [thread:$0]  %s1225_s3, 4096, %s1167_s27, [#allocation9], %s1097_s1, %s1097_s1, %s1098_s21  }
  0x45   :  { %1085 = dma.done.wait [#allocation3], 128  }
  0x46   :  { %1086 = vsyncadd [#allocation3], 4294967168 }
  0x47   :  { %1087 = dma.done.wait [#allocation6], 4160  }
  0x48   :  { %1088 = vsyncadd [#allocation6], 4294963136 }
  0x49   :  { %1089 = dma.done.wait [#allocation9], 4096  }
  0x4a   :  { %1090 = vsyncadd [#allocation9], 4294963200  ;;  %v1101_v0 = vmov 0   ;;  %v894_v1 = vld [vmem:[#allocation5 + $0x4] ss:$16 sps:$4 sm:$0xff]   ;;  %v942_v34 = vld [vmem:[#allocation2] sm:$0xff]  }
  0x4b   :  { %332 = vmatprep.mubr.bf16.mxu0 %v1101_v0  ;;  %375 = vmatprep.mubr.bf16.mxu1 %v1101_v0  ;;  %v896_v2 = vld [vmem:[#allocation5 + $0xc] ss:$16 sps:$4 sm:$0xff]   ;;  %v898_v3 = vld [vmem:[#allocation5] ss:$16 sps:$4 sm:$0xff]   ;;  %v899_v4 = vld [vmem:[#allocation5 + $0x8] ss:$16 sps:$4 sm:$0xff]  }
  0x4c   :  { %300 = vmatprep.subr.bf16.mxu0 %v894_v1  ;;  %343 = vmatprep.subr.bf16.mxu1 %v896_v2  ;;  %v900_v5 = vld [vmem:[#allocation5 + $0x24] ss:$16 sps:$4 sm:$0xff]   ;;  %v902_v6 = vld [vmem:[#allocation5 + $0x2c] ss:$16 sps:$4 sm:$0xff]   ;;  %v904_v7 = vld [vmem:[#allocation5 + $0x20] ss:$16 sps:$4 sm:$0xff]   ;;  %v114_v2 = vlaneseq }
  0x4d   :  { %301 = vmatpush1.bf16.msra.mxu0 %v898_v3  ;;  %344 = vmatpush1.bf16.msra.mxu1 %v899_v4  ;;  %v905_v8 = vld [vmem:[#allocation5 + $0x28] ss:$16 sps:$4 sm:$0xff]   ;;  %v906_v9 = vld [vmem:[#allocation5 + $0x44] ss:$16 sps:$4 sm:$0xff]   ;;  %v908_v10 = vld [vmem:[#allocation5 + $0x4c] ss:$16 sps:$4 sm:$0xff]  }
  0x4e   :  { %302 = vmatprep.subr.bf16.mxu0 %v900_v5  ;;  %345 = vmatprep.subr.bf16.mxu1 %v902_v6  ;;  %v910_v11 = vld [vmem:[#allocation5 + $0x40] ss:$16 sps:$4 sm:$0xff]   ;;  %v911_v12 = vld [vmem:[#allocation5 + $0x48] ss:$16 sps:$4 sm:$0xff]   ;;  %v912_v13 = vld [vmem:[#allocation5 + $0x64] ss:$16 sps:$4 sm:$0xff]  }
  0x4f   :  { %v914_v14 = vld [vmem:[#allocation5 + $0x6c] ss:$16 sps:$4 sm:$0xff]   ;;  %v916_v15 = vld [vmem:[#allocation5 + $0x60] ss:$16 sps:$4 sm:$0xff]   ;;  %v917_v16 = vld [vmem:[#allocation5 + $0x68] ss:$16 sps:$4 sm:$0xff]  }
  0x50   :  { %v918_v17 = vld [vmem:[#allocation5 + $0x84] ss:$16 sps:$4 sm:$0xff]   ;;  %v920_v18 = vld [vmem:[#allocation5 + $0x8c] ss:$16 sps:$4 sm:$0xff]   ;;  %v922_v19 = vld [vmem:[#allocation5 + $0x80] ss:$16 sps:$4 sm:$0xff]  }
  0x51   :  { %303 = vmatpush1.bf16.msra.mxu0 %v904_v7  ;;  %346 = vmatpush1.bf16.msra.mxu1 %v905_v8  ;;  %v923_v20 = vld [vmem:[#allocation5 + $0x88] ss:$16 sps:$4 sm:$0xff]   ;;  %v924_v21 = vld [vmem:[#allocation5 + $0xa4] ss:$16 sps:$4 sm:$0xff]   ;;  %v926_v22 = vld [vmem:[#allocation5 + $0xac] ss:$16 sps:$4 sm:$0xff]  }
  0x52   :  { %304 = vmatprep.subr.bf16.mxu0 %v906_v9  ;;  %347 = vmatprep.subr.bf16.mxu1 %v908_v10  ;;  %v928_v23 = vld [vmem:[#allocation5 + $0xa0] ss:$16 sps:$4 sm:$0xff]   ;;  %v929_v24 = vld [vmem:[#allocation5 + $0xa8] ss:$16 sps:$4 sm:$0xff]   ;;  %v930_v25 = vld [vmem:[#allocation5 + $0xc4] ss:$16 sps:$4 sm:$0xff]  }
  0x53   :  { %v932_v26 = vld [vmem:[#allocation5 + $0xcc] ss:$16 sps:$4 sm:$0xff]   ;;  %v934_v27 = vld [vmem:[#allocation5 + $0xc0] ss:$16 sps:$4 sm:$0xff]   ;;  %v935_v28 = vld [vmem:[#allocation5 + $0xc8] ss:$16 sps:$4 sm:$0xff]  }
  0x54   :  { %v936_v29 = vld [vmem:[#allocation5 + $0xe4] ss:$16 sps:$4 sm:$0xff]   ;;  %v938_v30 = vld [vmem:[#allocation5 + $0xec] ss:$16 sps:$4 sm:$0xff]   ;;  %v940_v31 = vld [vmem:[#allocation5 + $0xe0] ss:$16 sps:$4 sm:$0xff]  }
  0x55   :  { %305 = vmatpush1.bf16.msra.mxu0 %v910_v11  ;;  %348 = vmatpush1.bf16.msra.mxu1 %v911_v12  ;;  %v941_v32 = vld [vmem:[#allocation5 + $0xe8] ss:$16 sps:$4 sm:$0xff]   ;;  %v947_v38 = vld [vmem:[#allocation8 + $0x48] sm:$0xff]   ;;  %v955_v46 = vld [vmem:[#allocation8 + $0x58] sm:$0xff]   ;;  %v115_v3 = vshrl.u32 %v114_v2, 7 }
  0x56   :  { %306 = vmatprep.subr.bf16.mxu0 %v912_v13  ;;  %349 = vmatprep.subr.bf16.mxu1 %v914_v14  ;;  %v943_v33 = vld [vmem:[#allocation8 + $0x40] sm:$0xff]   ;;  %v948_v39 = vld [vmem:[#allocation8 + $0xc8] sm:$0xff]   ;;  %v951_v42 = vld [vmem:[#allocation8 + $0x50] sm:$0xff]  }
  0x57   :  { %v944_v35 = vld [vmem:[#allocation8 + $0xc0] sm:$0xff]   ;;  %v949_v40 = vld [vmem:[#allocation8 + $0x8] sm:$0xff]   ;;  %v952_v43 = vld [vmem:[#allocation8 + $0xd0] sm:$0xff]   ;;  %v116_v4 = vsub.s32 0, %v115_v3  ;;  %v124_v5 = vsub.s32 2, %v115_v3  ;;  %v120_v7 = vsub.s32 1, %v115_v3 }
  0x58   :  { %v945_v36 = vld [vmem:[#allocation8] sm:$0xff]   ;;  %v950_v41 = vld [vmem:[#allocation8 + $0x88] sm:$0xff]   ;;  %v953_v44 = vld [vmem:[#allocation8 + $0x10] sm:$0xff]   ;;  %v128_v8 = vsub.s32 3, %v115_v3 }
  0x59   :  { %307 = vmatpush1.bf16.msra.mxu0 %v916_v15  ;;  %350 = vmatpush1.bf16.msra.mxu1 %v917_v16  ;;  %v946_v37 = vld [vmem:[#allocation8 + $0x80] sm:$0xff]   ;;  %v954_v45 = vld [vmem:[#allocation8 + $0x90] sm:$0xff]   ;;  %v956_v47 = vld [vmem:[#allocation8 + $0xd8] sm:$0xff]  }
  0x5a   :  { %308 = vmatprep.subr.bf16.mxu0 %v918_v17  ;;  %351 = vmatprep.subr.bf16.mxu1 %v920_v18  ;;  %v957_v48 = vld [vmem:[#allocation8 + $0x18] sm:$0xff]   ;;  %v959_v50 = vld [vmem:[#allocation8 + $0x60] sm:$0xff]   ;;  %v963_v54 = vld [vmem:[#allocation8 + $0x68] sm:$0xff]  }
  0x5b   :  { %v958_v49 = vld [vmem:[#allocation8 + $0x98] sm:$0xff]   ;;  %v960_v51 = vld [vmem:[#allocation8 + $0xe0] sm:$0xff]   ;;  %v964_v55 = vld [vmem:[#allocation8 + $0xe8] sm:$0xff]  }
  0x5c   :  { %v961_v52 = vld [vmem:[#allocation8 + $0x20] sm:$0xff]   ;;  %v965_v56 = vld [vmem:[#allocation8 + $0x28] sm:$0xff]   ;;  %v967_v58 = vld [vmem:[#allocation8 + $0x70] sm:$0xff]  }
  0x5d   :  { %309 = vmatpush1.bf16.msra.mxu0 %v922_v19  ;;  %352 = vmatpush1.bf16.msra.mxu1 %v923_v20  ;;  %v962_v53 = vld [vmem:[#allocation8 + $0xa0] sm:$0xff]   ;;  %v966_v57 = vld [vmem:[#allocation8 + $0xa8] sm:$0xff]   ;;  %v968_v59 = vld [vmem:[#allocation8 + $0xf0] sm:$0xff]  }
  0x5e   :  { %310 = vmatprep.subr.bf16.mxu0 %v924_v21  ;;  %353 = vmatprep.subr.bf16.mxu1 %v926_v22  ;;  %v969_v60 = vld [vmem:[#allocation8 + $0x30] sm:$0xff]   ;;  %v971_v62 = vld [vmem:[#allocation8 + $0x78] sm:$0xff]  }
  0x5f   :  { %v970_v61 = vld [vmem:[#allocation8 + $0xb0] sm:$0xff]   ;;  %v972_v63 = vld [vmem:[#allocation8 + $0xf8] sm:$0xff]  }
  0x60   :  { %v973_v0 = vld [vmem:[#allocation8 + $0x38] sm:$0xff]  }
  0x61   :  { %311 = vmatpush1.bf16.msra.mxu0 %v928_v23  ;;  %354 = vmatpush1.bf16.msra.mxu1 %v929_v24  ;;  %v974_v1 = vld [vmem:[#allocation8 + $0xb8] sm:$0xff]  }
  0x62   :  { %312 = vmatprep.subr.bf16.mxu0 %v930_v25  ;;  %355 = vmatprep.subr.bf16.mxu1 %v932_v26  ;;  %v112_v6 = vld [vmem:[#allocation7] sm:$0xf] }
  0x63   :  { %v117_v9 = vrot.slane %v112_v6, %v116_v4  ;;  %v125_v10 = vrot.slane %v112_v6, %v124_v5  ;;  %v121_v11 = vrot.slane %v112_v6, %v120_v7  ;;  %v129_v12 = vrot.slane %v112_v6, %v128_v8 }
  0x65   :  { %313 = vmatpush1.bf16.msra.mxu0 %v934_v27  ;;  %356 = vmatpush1.bf16.msra.mxu1 %v935_v28 }
  0x66   :  { %314 = vmatprep.subr.bf16.mxu0 %v936_v29  ;;  %357 = vmatprep.subr.bf16.mxu1 %v938_v30 }
  0x69   :  { %315 = vmatpush1.bf16.msra.mxu0 %v940_v31  ;;  %358 = vmatpush1.bf16.msra.mxu1 %v941_v32 }
  0x6a   :  { %838 = vmatprep.subr.bf16.mxu0 %v943_v33  ;;  %860 = vmatprep.subr.bf16.mxu1 %v944_v35 }
  0x6c   :  { %333 = vmatmul.mubr.bf16.vlgmr.msra.gmra.mrb[0].mxu0 %v942_v34  ;;  %376 = vmatmul.mubr.bf16.vlgmr.msra.gmra.mrb[0].mxu1 %v942_v34 }
  0x6d   :  { %839 = vmatpush3.bf16.msra.mxu0 %v945_v36  ;;  %861 = vmatpush3.bf16.msra.mxu1 %v946_v37 }
  0x6e   :  { %840 = vmatprep.subr.bf16.mxu0 %v947_v38  ;;  %862 = vmatprep.subr.bf16.mxu1 %v948_v39 }
  0x71   :  { %841 = vmatpush3.bf16.msra.mxu0 %v949_v40  ;;  %863 = vmatpush3.bf16.msra.mxu1 %v950_v41 }
  0x72   :  { %842 = vmatprep.subr.bf16.mxu0 %v951_v42  ;;  %864 = vmatprep.subr.bf16.mxu1 %v952_v43  ;;  %v805_v43 = vld [vmem:[%s1226_s4] ss:$0 sm:$0xff]  ;;  %s1102_s4 = smov [#allocation10]  }
  0x73   :  { %s758_s26 = sshll.u32 %s1102_s4, 4  ;;  %s759_s26 = int_to_ptr.vmem [resolvable:$true] %s758_s26 }
  0x74   :  { %s1063_s27 = scalar_lea.vmem %s759_s26, 256  ;;  %p1068_p5 = scmp.lt.s32.totalorder %s759_s26, %s759_s26 }
  0x75   :  { %843 = vmatpush3.bf16.msra.mxu0 %v953_v44  ;;  %865 = vmatpush3.bf16.msra.mxu1 %v954_v45  ;;  %p1064_p4 = scmp.ne.s32.totalorder %s759_s26, %s1063_s27  ;;  %p1069_p6 = scmp.lt.s32.totalorder %s1063_s27, %s1063_s27 }
  0x76   :  { %844 = vmatprep.subr.bf16.mxu0 %v955_v46  ;;  %866 = vmatprep.subr.bf16.mxu1 %v956_v47 }
  0x77   :  { %p1070_p7 = por %p1069_p6, %p1068_p5 }
  0x79   :  { %845 = vmatpush3.bf16.msra.mxu0 %v957_v48  ;;  %867 = vmatpush3.bf16.msra.mxu1 %v958_v49  ;;  %p1071_p8 = pnand %p1070_p7, %p1064_p4 }
  0x7a   :  { %846 = vmatprep.subr.bf16.mxu0 %v959_v50  ;;  %868 = vmatprep.subr.bf16.mxu1 %v960_v51 }
  0x7d   :  { %847 = vmatpush3.bf16.msra.mxu0 %v961_v52  ;;  %869 = vmatpush3.bf16.msra.mxu1 %v962_v53  ;;  %v743_v53 = vld [vmem:[%s1227_s5] sm:$0xff] }
  0x7e   :  { %848 = vmatprep.subr.bf16.mxu0 %v963_v54  ;;  %870 = vmatprep.subr.bf16.mxu1 %v964_v55  ;;  %vm745_vm0 = vcmp.ge.u32.totalorder %v743_v53, 429496730 }
  0x81   :  { %849 = vmatpush3.bf16.msra.mxu0 %v965_v56  ;;  %871 = vmatpush3.bf16.msra.mxu1 %v966_v57 }
  0x82   :  { %850 = vmatprep.subr.bf16.mxu0 %v967_v58  ;;  %872 = vmatprep.subr.bf16.mxu1 %v968_v59  ;;  %v744_v58 = vld [vmem:[%s1227_s5 + $0x8] sm:$0xff] }
  0x83   :  { %vm746_vm1 = vcmp.ge.u32.totalorder %v744_v58, 429496730 }
  0x85   :  { %851 = vmatpush3.bf16.msra.mxu0 %v969_v60  ;;  %873 = vmatpush3.bf16.msra.mxu1 %v970_v61 }
  0x86   :  { %852 = vmatprep.subr.bf16.mxu0 %v971_v62  ;;  %874 = vmatprep.subr.bf16.mxu1 %v972_v63 }
  0x89   :  { %853 = vmatpush3.bf16.msra.mxu0 %v973_v0  ;;  %875 = vmatpush3.bf16.msra.mxu1 %v974_v1 }
 0x13f   :  { %v334_v13 = vpop.f32.mrb[0].mxu0  ;;  %v377_v14 = vpop.f32.mrb[0].mxu1 }
 0x140   :  { %v335_v15 = vadd.f32 %v334_v13, %v117_v9  ;;  %v378_v16 = vadd.f32 %v377_v14, %v125_v10  ;;  %v336_v17 = vpop.f32.mrb[1].mxu0  ;;  %v379_v18 = vpop.f32.mrb[1].mxu1 }
 0x141   :  { %v337_v19 = vadd.f32 %v336_v17, %v121_v11  ;;  %v380_v20 = vadd.f32 %v379_v18, %v129_v12  ;;  %v338_v21 = vpop.f32.mrb[2].mxu0  ;;  %v381_v22 = vpop.f32.mrb[2].mxu1 }
 0x142   :  { %v388_v23 = vmax.f32 %v378_v16, 0.0  ;;  %v339_v24 = vadd.f32 %v338_v21, %v117_v9  ;;  %v382_v25 = vadd.f32 %v381_v22, %v125_v10  ;;  %v340_v26 = vpop.f32.mrb[3].mxu0  ;;  %v383_v27 = vpop.f32.mrb[3].mxu1  ;;  %v386_v31 = vmax.f32 %v335_v15, 0.0 }
 0x143   :  { %v389_v28 = vmax.f32 %v380_v20, 0.0  ;;  %v341_v29 = vadd.f32 %v340_v26, %v121_v11  ;;  %v384_v30 = vadd.f32 %v383_v27, %v129_v12  ;;  %v387_v34 = vmax.f32 %v337_v19, 0.0 }
 0x144   :  { %v390_v32 = vmax.f32 %v339_v24, 0.0  ;;  %v392_v33 = vmax.f32 %v382_v25, 0.0 }
 0x145   :  { %v391_v35 = vmax.f32 %v341_v29, 0.0  ;;  %v393_v36 = vmax.f32 %v384_v30, 0.0 }
 0x146   :  { %v394_v37 = vpack.c.bf16 %v390_v32, %v386_v31  ;;  %v396_v38 = vpack.c.bf16 %v392_v33, %v388_v23 }
 0x147   :  { %v395_v39 = vpack.c.bf16 %v391_v35, %v387_v34  ;;  %v397_v40 = vpack.c.bf16 %v393_v36, %v389_v28 }
 0x149   :  { %693 = vmatprep.mubr.bf16.mxu0 %v395_v39  ;;  %734 = vmatprep.mubr.bf16.mxu1 %v397_v40 }
 0x14a   :  { %694 = vmatmul.mubr.bf16.vlgmr.msra.gmra.mrb[4].mxu0 %v394_v37  ;;  %735 = vmatmul.mubr.bf16.vlgmr.msra.gmra.mrb[4].mxu1 %v396_v38 }
 0x21d   :  { %v854_v41 = vpop.f32.mrb[4].mxu0  ;;  %v876_v42 = vpop.f32.mrb[4].mxu1 }
 0x21e   :  { %v855_v44 = vpop.f32.mrb[5].mxu0  ;;  %v877_v45 = vpop.f32.mrb[5].mxu1 }
 0x21f   :  { %v856_v46 = vadd.f32 %v855_v44, %v854_v41  ;;  %v878_v47 = vadd.f32 %v877_v45, %v876_v42  ;;  %v857_v48 = vpop.f32.mrb[6].mxu0  ;;  %v879_v49 = vpop.f32.mrb[6].mxu1 }
 0x220   :  { %v858_v50 = vpop.f32.mrb[7].mxu0  ;;  %v880_v51 = vpop.f32.mrb[7].mxu1 }
 0x221   :  { %v696_v52 = vadd.f32 %v856_v46, %v805_v43  ;;  %v859_v54 = vadd.f32 %v858_v50, %v857_v48  ;;  %v881_v55 = vadd.f32 %v880_v51, %v879_v49 }
 0x223   :  { %v737_v56 = vadd.f32 %v878_v47, %v696_v52  ;;  %v699_v57 = vadd.f32 %v859_v54, %v805_v43 }
 0x225   :  { %v747_v59 = vmul.f32 1.1111112, %v737_v56  ;;  %v740_v60 = vadd.f32 %v881_v55, %v699_v57 }
 0x227   :  { %v749_v61 = vsel %vm745_vm0, %v747_v59, 0.0  ;;  %v748_v62 = vmul.f32 1.1111112, %v740_v60 }
 0x228   :  { %751 = vst [vmem:[#allocation10] sm:$0xff] %v749_v61 }
 0x229   :  { %v750_v63 = vsel %vm746_vm1, %v748_v62, 0.0 }
 0x22a   :  { %752 = vst [vmem:[#allocation10 + $0x8] sm:$0xff] %v750_v63 }
 0x22b   :  { %1074 = shalt.err (!%p1071_p8)
}
 0x22c   :  { %s1075_s29 = scalar_lea.hbm %s1228_s6, 256 }
 0x22d   :  { %p1076_p9 = scmp.ne.s32.totalorder %s1228_s6, %s1075_s29  ;;  %p1079_p10 = scmp.lt.u32.totalorder %s1075_s29, %s1228_s6 }
 0x22f   :  { %p1081_p11 = pnand %p1079_p10, %p1076_p9 }
 0x231   :  { %1084 = shalt.err (!%p1081_p11)
}
 0x232   :  { %s1103_s10 = smov 128   ;;  %s1104_s0 = smov 8  }
 0x233   :  { %764 = dma.vmem_to_hbm [thread:$0]  %s759_s26, 256, %s1228_s6, [#allocation4], %s1103_s10, %s1103_s10, %s1104_s0  }
 0x234   :  { %1091 = dma.done.wait [#allocation4], 256  }
 0x235   :  { %1092 = vsyncadd [#allocation4], 4294967040 }
 0x236   :  { %768 = vsyncpa [#allocation3], 1 }
 0x237   :  { %769 = vsyncpa [#allocation6], 1 }
 0x238   :  { %770 = vsyncpa [#allocation9], 1 }
 0x239   :  { %771 = vsyncpa [#allocation4], 1 }

</bundles_post_ra>
